<compile_context>
chip_gen: v6e
topology: v6e:2x2x1
jax: 0.10.0
libtpu: 0.0.40
codegen_flags: <defaults>
</compile_context>

<pallas_src>
import jax
import jax.numpy as jnp
from jax.experimental import pallas as pl
from jax.experimental.pallas import tpu as pltpu


def _emb_gather_kernel(ids_ref, table_ref, out_ref):
    """Copy one gathered embedding row to its output slot.

    ids_ref   : (N,) int32 in SMEM (scalar-prefetch; consumed by the index_maps)
    table_ref : (1, 1, E)  row `ids_ref[i]` of the embedding table (auto-DMA'd)
    out_ref   : (1, 1, E)  row `i` of the output
    """
    del ids_ref  # only used by the BlockSpec index_maps
    out_ref[...] = table_ref[...]


def que_embedder_forward(emb_table, q):
    """x = emb_table[q] via a Pallas data-dependent-gather kernel.

    emb_table : (2*num_q, E) float32
    q         : (B, L) int   indices in [0, 2*num_q)
    returns   : (B, L, E) float32
    """
    B, L = q.shape
    R, E = emb_table.shape
    N = B * L

    ids = q.reshape(N).astype(jnp.int32)
    # Reshape to (R, 1, E) so every block's last-two dims equal the full array
    # dims (1, E): no (8, 128) block-shape issues for any E, and the row axis
    # (the gathered one) is the untiled leading axis.
    table3 = emb_table.reshape(R, 1, E)

    out = pl.pallas_call(
        _emb_gather_kernel,
        out_shape=jax.ShapeDtypeStruct((N, 1, E), emb_table.dtype),
        grid_spec=pltpu.PrefetchScalarGridSpec(
            num_scalar_prefetch=1,          # `ids` lands in SMEM before the grid runs
            grid=(N,),                      # one gathered row per grid step
            in_specs=[
                # Data-dependent gather: block row index comes from the
                # prefetched ids, so only needed table rows are DMA'd.
                pl.BlockSpec((1, 1, E), lambda i, ids: (ids[i], 0, 0)),
            ],
            out_specs=pl.BlockSpec((1, 1, E), lambda i, ids: (i, 0, 0)),
        ),
        compiler_params=pltpu.CompilerParams(
            # Each grid step writes a distinct output row -> fully parallel
            # (lets v7x shard the gather across its 2 TensorCores).
            dimension_semantics=("parallel",),
        ),
    )(ids, table3)

    return out.reshape(B, L, E)


class QueEmbedderPallas:
    """JAX/Pallas equivalent of pykt QueEmbedder (random init, no pretrained emb)."""

    def __init__(self, num_q, emb_size, key=None):
        self.num_q = num_q
        self.emb_size = emb_size
        key = jax.random.PRNGKey(0) if key is None else key
        # nn.Embedding(num_q * 2, emb_size): weights ~ N(0, 1)
        self.emb_table = jax.random.normal(key, (2 * num_q, emb_size), jnp.float32)
        # TODO(synk): the emb_path / flag_load_emb branch (pretrained embeddings
        # read from a JSON file, re-normalized, plus the nn.Linear projection
        # used when loaded_emb_size != emb_size) requires file I/O and is not
        # implemented; only the default random-init branch is covered.

    def __call__(self, q):
        return que_embedder_forward(self.emb_table, q)

    # Pure-JAX reference (same math, no Pallas) for correctness check.
    def reference(self, q):
        return jnp.take(self.emb_table, q, axis=0)


if __name__ == "__main__":
    # E = 128 keeps the output stores lane-dense (unmasked vst); any E works.
    num_q, emb_size = 16, 128
    B, L = 2, 8

    key = jax.random.PRNGKey(0)
    k_q, k_tbl = jax.random.split(key)
    q = jax.random.randint(k_q, (B, L), 0, 2 * num_q, dtype=jnp.int32)

    model = QueEmbedderPallas(num_q, emb_size, key=k_tbl)

    x = jax.block_until_ready(model(q))
    assert x.shape == (B, L, emb_size) and x.dtype == jnp.float32

    x_ref = jax.block_until_ready(model.reference(q))
    assert jnp.allclose(x, x_ref), f"max diff {jnp.max(jnp.abs(x - x_ref))}"

    print("KERNEL_OK")
</pallas_src>

<mosaic_0001>
module attributes {stable_mosaic.version = 11 : i64} {
  func.func @_emb_gather_kernel(%arg0: i32, %arg1: memref<16xi32, #tpu.memory_space<smem>>, %arg2: memref<1x1x128xf32, #tpu.memory_space<vmem>>, %arg3: memref<1x1x128xf32, #tpu.memory_space<vmem>>) attributes {dimension_semantics = [#tpu.dimension_semantics<parallel>], iteration_bounds = array<i64: 16>, scalar_prefetch = 1 : i64, scratch_operands = 0 : i64, tpu.core_type = #tpu.core_type<tc>, window_params = [{transform_indices = @transform_0, window_bounds = array<i64: 1, 1, 128>}, {transform_indices = @transform_1, window_bounds = array<i64: 1, 1, 128>}]} {
    %c0 = arith.constant 0 : index
    %c0_0 = arith.constant 0 : index
    %c0_1 = arith.constant 0 : index
    %0 = vector.load %arg2[%c0, %c0_0, %c0_1] : memref<1x1x128xf32, #tpu.memory_space<vmem>>, vector<1x1x128xf32>
    %c0_2 = arith.constant 0 : index
    %c0_3 = arith.constant 0 : index
    %c0_4 = arith.constant 0 : index
    %1 = vector.load %arg3[%c0_2, %c0_3, %c0_4] : memref<1x1x128xf32, #tpu.memory_space<vmem>>, vector<1x1x128xf32>
    tpu.vector_store %arg3[%c0_2, %c0_3, %c0_4], %0 {strides = array<i32>} : memref<1x1x128xf32, #tpu.memory_space<vmem>>, vector<1x1x128xf32>,
    return
  }
  func.func @transform_0(%arg0: i32, %arg1: memref<16xi32, #tpu.memory_space<smem>>) -> (i32, i32, i32) {
    %0 = arith.index_cast %arg0 : i32 to index
    %1 = memref.load %arg1[%0] : memref<16xi32, #tpu.memory_space<smem>>
    %c0_i32 = arith.constant 0 : i32
    %c0_i32_0 = arith.constant 0 : i32
    %c0_i32_1 = arith.constant 0 : i32
    return %1, %c0_i32, %c0_i32_0 : i32, i32, i32
  }
  func.func @transform_1(%arg0: i32, %arg1: memref<16xi32, #tpu.memory_space<smem>>) -> (i32, i32, i32) {
    %c0_i32 = arith.constant 0 : i32
    %c0_i32_0 = arith.constant 0 : i32
    %c0_i32_1 = arith.constant 0 : i32
    return %arg0, %c0_i32, %c0_i32_0 : i32, i32, i32
  }
}

</mosaic_0001>

<bundles_post_ra>
// kernel: tpu_custom_call.1
= control target key start
LH: loop header
LB: loop body
LE: loop exit
PB: predicated region body
PF: predicated region fallthrough
CT: control target
= control target key end

     0   :  { %s426_s9 = smov [#allocation3]   ;;  %s619_s0 = inlined_call_operand.hbm [shape: s32[16], index: 0, kind: input, shape index: {}]   ;;  %s620_s1 = inlined_call_operand.hbm [shape: f32[32,1,128], index: 1, kind: input, shape index: {}]   ;;  %s621_s2 = inlined_call_operand.hbm [shape: f32[16,1,128], index: 2, kind: output, shape index: {}]  }
   0x1   :  { %8 = dma.hbm_to_smem %s619_s0, 16, %s426_s9, [#allocation2] }
   0x2   :  { %388 = dma.done.wait [#allocation2], 16 }
   0x3   :  { %389 = vsyncadd [#allocation2], 4294967280 }
   0x4   :  { %10 = sfence }
   0x5   :  { %11 = vsyncpa [#allocation5], 0 }
   0x6   :  { %13 = vsyncpa [#allocation5 + $0x1], 0 }
   0x7   :  { %14 = vsyncpa [#allocation6], 0 }
   0x8   :  { %16 = vsyncpa [#allocation6 + $0x1], 0  ;;  %s447_s12 = smov 0   ;;  %s449_s13 = smov 0  }
   0x9   :  { %s451_s14 = smov 0   ;;  %s453_s15 = smov 0  }
   0xa   :  { %s455_s16 = smov 0   ;;  %s457_s17 = smov 0  }
   0xb   :  { %s459_s0 = smov 0  }
   0xc LB: > { %s481_s18 = sadd.s32 4294967295, %s424_s0   ;;  %s215_s19 = sadd.s32 4294967294, %s424_s0   ;;  %s424_s0 = sphi %s459_s0, %s640_s0   ;;  %s420_s17 = sphi %s457_s17, %s639_s17   ;;  %s416_s16 = sphi %s455_s16, %s638_s16   ;;  %s412_s15 = sphi %s453_s15, %s637_s15   ;;  %s408_s14 = sphi %s451_s14, %s636_s14   ;;  %s404_s13 = sphi %s449_s13, %s635_s13   ;;  %s400_s12 = sphi %s447_s12, %s634_s12  }
   0xd   : > { %s485_s20 = sadd.s32 1, %s424_s0   ;;  %s26_s21 = sld [smem:[#allocation3 + %s424_s0]] }
   0xe   : > { %s27_s22 = sld [smem:[#allocation3 + %s485_s20]]  ;;  %s31_s23 = sadd.s32 1, %s420_s17 }
   0xf   : > { %p38_p0 = scmp.ne.s32.totalorder %s420_s17, %s416_s16  ;;  %p39_p1 = scmp.eq.s32.totalorder %s424_s0, 0 }
  0x10   : > { %p44_p2 = scmp.ne.s32.totalorder %s416_s16, %s412_s15  ;;  %p45_p3 = scmp.eq.s32.totalorder %s481_s18, 0 }
  0x11   : > { %p495_p4 = por %p39_p1, %p38_p0  ;;  %s54_s25 = ssub.s32 %s424_s0, %s485_s20 }
  0x12   : > { %p501_p5 = por %p45_p3, %p44_p2  ;;  %p55_p6 = scmp.eq.s32.totalorder %s54_s25, 0 }
  0x13   : > { %s57_s27 = sadd.s32 1, %s408_s14  ;;  %p67_p7 = scmp.ne.s32.totalorder %s408_s14, %s404_s13 }
  0x14   : > { %s625_s26 = scalar_select %p501_p5, 1, 0 }
  0x15   : > { %s28_s28 = ssub.s32 %s26_s21, %s27_s22  ;;  %p68_p8 = scmp.eq.s32.totalorder %s481_s18, 15 }
  0x16   : > { %p29_p9 = scmp.eq.s32.totalorder %s28_s28, 0  ;;  %p73_p10 = scmp.ne.s32.totalorder %s404_s13, %s400_s12 }
  0x17   : > { %s512_s29 = scalar_select %p55_p6, %s408_s14, %s57_s27  }
  0x18   : > { %s515_s30 = scalar_select %p29_p9, %s420_s17, %s31_s23  }
  0x19   : > { %p517_p11 = por %p68_p8, %p67_p7  ;;  %p74_p12 = scmp.eq.s32.totalorder %s215_s19, 15 }
  0x1a   : > { %p239_p0 = scmp.lt.s32.totalorder %s424_s0, 16  ;;  %s94_s5 = sand.u32 1, %s420_s17  }
  0x1b   : > { %s626_s3 = scalar_select %p517_p11, 1, 0 }
  0x1c   : > { %p521_p13 = por %p74_p12, %p73_p10  ;;  %p534_p1 = pnand %p239_p0, %p495_p4 }
  0x1d   : > { %s223_s6 = scalar_select %p495_p4, [#allocation3], [#allocation8] }
  0x1e   : > { %s627_s4 = scalar_select %p521_p13, 1, 0 }
  0x1f   : > { %s224_s7 = scalar_select %p495_p4, %s424_s0, 0 }
  0x20   : > { %s642_s6 = smov (!%p239_p0, %s223_s6), [#allocation9]  ;;  %p219_p2 = scmp.ge.s32.totalorder %s424_s0, 1 }
  0x21   : > { %s644_s7 = smov (!%p239_p0, %s224_s7), 0  ;;  %s97_s10 = scalar_lea.vmem [#allocation4], %s94_s5 }
  0x22   : > { %s98_s9 = sld [smem:[%s642_s6 + %s644_s7]]  ;;  %s105_s11 = sshll.u32 %s97_s10, 4  ;;  %s544_s11 = int_to_ptr.vmem [resolvable:$true] %s105_s11 }
  0x23   : > { %p110_p3 = scmp.lt.s32.totalorder %s424_s0, 17  ;;  %s95_s24 = scalar_lea.sflag [#allocation5], %s94_s5 }
  0x24   : > { %p308_p7 = pneg %p534_p1  ;;  %s311_s6 = scalar_lea.hbm %s620_s1, 512 }
  0x25   : > { %p540_p6 = pnand %p219_p2, %p110_p3 }
  0x27   : > { %s629_s15 = scalar_select %p540_p6, 1, 0 }
  0x28   : > { %s218_s19 = sshll.u32 %s98_s9, 4 }
  0x29   : > { %s103_s23 = scalar_lea.hbm %s620_s1, %s218_s19 }
  0x2a   : > { %s306_s25 = scalar_lea.hbm %s103_s23, 16  ;;  %p312_p10 = scmp.lt.s32.totalorder %s103_s23, %s620_s1 }
  0x2b   : > { %p307_p4 = scmp.ne.s32.totalorder %s103_s23, %s306_s25  ;;  %p313_p12 = scmp.lt.s32.totalorder %s311_s6, %s306_s25 }
  0x2d   : > { %p309_p8 = pnand %p308_p7, %p307_p4  ;;  %p314_p0 = por %p313_p12, %p312_p10 }
  0x2f   : > { %p310_p9 = pneg %p309_p8 }
  0x31   : > { %p315_p2 = pnand %p314_p0, %p310_p9 }
  0x33   : > { %318 = shalt.err (!%p315_p2)
}
  0x34   : > { %s319_s5 = scalar_lea.vmem %s544_s11, 16  ;;  %s427_s9 = smov [#allocation4]  }
  0x35   : > { %p320_p3 = scmp.ne.s32.totalorder %s544_s11, %s319_s5  ;;  %s324_s19 = sshll.u32 %s427_s9, 4  ;;  %s325_s19 = int_to_ptr.vmem [resolvable:$false] %s324_s19 }
  0x36   : > { %s326_s21 = scalar_lea.vmem %s325_s19, 32  ;;  %p327_p8 = scmp.lt.s32.totalorder %s544_s11, %s325_s19 }
  0x37   : > { %p322_p13 = pnand %p320_p3, %p308_p7  ;;  %p328_p11 = scmp.lt.s32.totalorder %s326_s21, %s319_s5 }
  0x39   : > { %p323_p4 = pneg %p322_p13  ;;  %p329_p5 = por %p328_p11, %p327_p8 }
  0x3b   : > { %p330_p6 = pnand %p329_p5, %p323_p4 }
  0x3d   : > { %333 = shalt.err (!%p330_p6)
}
  0x3e   : > { %234 = dma.hbm_to_vmem [thread:$0]  (!%p534_p1), %s103_s23, 16, %s544_s11, %s95_s24  }
  0x3f   : > { %p630_p9 = scmp.ne.s32.totalorder %s629_s15, 0 }
  0x40   : > { %s116_s22 = sand.u32 (!%p630_p9), 1, %s416_s16   ;;  %p631_p13 = scmp.ne.s32.totalorder (!%p630_p9), %s625_s26, 0 }
  0x41   : > { %114 = sbr.rel (%p630_p9) target bundleno = 96 (0x60), region = 24  ;;  %s117_s25 = scalar_lea.sflag (!%p630_p9), [#allocation5], %s116_s22 }
  0x42   : > { %s119_s27 = scalar_lea.vmem (!%p630_p9), [#allocation4], %s116_s22 }
  0x46   : > { %391 = dma.done.wait (%p631_p13), %s117_s25, 16  }
  0x47   : > { %393 = vsyncadd (%p631_p13), %s117_s25, 4294967280  ;;  %s134_s28 = sand.u32 1, %s404_s13   ;;  %s220_s11 = sshll.u32 %s481_s18, 4  ;;  %v137_v0 = vld [vmem:[%s119_s27] sm:$0x1] }
  0x48   : > { %s135_s8 = scalar_lea.vmem [#allocation7], %s134_s28  ;;  %s150_s24 = scalar_lea.hbm %s621_s2, %s220_s11 }
  0x49   : > { %s152_s6 = sshll.u32 %s135_s8, 4  ;;  %138 = vst [vmem:[%s135_s8] sm:$0x1] %v137_v0  ;;  %s140_s26 = scalar_lea.sflag [#allocation6], %s134_s28  ;;  %s572_s6 = int_to_ptr.vmem [resolvable:$true] %s152_s6 }
  0x4a   : > { %s334_s7 = scalar_lea.vmem %s572_s6, 16  ;;  %p632_p11 = scmp.ne.s32.totalorder %s626_s3, 0 }
  0x4b   : > { %p335_p5 = scmp.ne.s32.totalorder %s572_s6, %s334_s7  ;;  %s428_s10 = smov [#allocation7]  }
  0x4c   : > { %s338_s5 = sshll.u32 %s428_s10, 4  ;;  %s339_s5 = int_to_ptr.vmem [resolvable:$false] %s338_s5 }
  0x4d   : > { %p336_p1 = pnand %p335_p5, %p632_p11  ;;  %s340_s18 = scalar_lea.vmem %s339_s5, 32 }
  0x4e   : > { %p341_p7 = scmp.lt.s32.totalorder %s572_s6, %s339_s5  ;;  %p342_p10 = scmp.lt.s32.totalorder %s340_s18, %s334_s7 }
  0x4f   : > { %p337_p6 = pneg %p336_p1 }
  0x50   : > { %p343_p12 = por %p342_p10, %p341_p7 }
  0x52   : > { %p344_p0 = pnand %p343_p12, %p337_p6 }
  0x54   : > { %347 = shalt.err (!%p344_p0)
}
  0x55   : > { %s348_s9 = scalar_lea.hbm %s150_s24, 16  ;;  %s352_s22 = scalar_lea.hbm %s621_s2, 256 }
  0x56   : > { %p349_p2 = scmp.ne.s32.totalorder %s150_s24, %s348_s9  ;;  %p353_p8 = scmp.lt.s32.totalorder %s150_s24, %s621_s2 }
  0x57   : > { %p354_p9 = scmp.lt.s32.totalorder %s352_s22, %s348_s9 }
  0x58   : > { %p350_p3 = pnand %p349_p2, %p632_p11 }
  0x59   : > { %p355_p13 = por %p354_p9, %p353_p8 }
  0x5a   : > { %p351_p4 = pneg %p350_p3 }
  0x5c   : > { %p356_p5 = pnand %p355_p13, %p351_p4 }
  0x5e   : > { %359 = shalt.err (!%p356_p5)
}
  0x5f   : > { %227 = dma.vmem_to_hbm [thread:$0]  (%p632_p11), %s572_s6, 16, %s150_s24, %s140_s26  }
  0x60 PF: > { %p240_p1 = scmp.ge.s32.totalorder %s424_s0, 2  ;;  %s164_s28 = sand.u32 1, %s400_s12  }
  0x61   : > { %p633_p6 = scmp.ne.s32.totalorder %s627_s4, 0  ;;  %s165_s8 = scalar_lea.sflag [#allocation6], %s164_s28 }
  0x63   : > { %p236_p7 = pnand %p240_p1, %p633_p6 }
  0x65   : > { %p237_p10 = pneg %p236_p7 }
  0x67   : > { %395 = dma.done.wait (%p237_p10), %s165_s8, 16  }
  0x68   : > { %397 = vsyncadd (%p237_p10), %s165_s8, 4294967280  ;;  %p19_p11 = scmp.ge.s32.totalorder %s485_s20, 18   ;;  %s634_s12 = smov %s404_s13 }
  0x69   : > { %s635_s13 = smov %s408_s14  ;;  %s636_s14 = smov %s512_s29 }
  0x6a   : > { %s637_s15 = smov %s416_s16  ;;  %s638_s16 = smov %s420_s17 }
  0x6b   : > { %s639_s17 = smov %s515_s30  ;;  %s640_s0 = smov %s485_s20 }
  0x6c   :  { %21 = sbr.rel (!%p19_p11) target bundleno = 12 (0xc), region = 69 }
  0x71   :  { %169 = vsyncpa [#allocation5], 1 }
  0x72   :  { %171 = vsyncpa [#allocation5 + $0x1], 1 }
  0x73   :  { %172 = vsyncpa [#allocation6], 1 }
  0x74   :  { %174 = vsyncpa [#allocation6 + $0x1], 1 }

</bundles_post_ra>
